<compile_context>
chip_gen: v7x
topology: tpu7x:2x2x1
jax: 0.10.0
libtpu: 0.0.40
codegen_flags: <defaults>
</compile_context>

<pallas_src>
import math

import jax
import jax.numpy as jnp
from jax.experimental import pallas as pl
from jax.experimental.pallas import tpu as pltpu

NEG_SLOPE = 0.2  # nn.LeakyReLU(0.2)


def _leaky_relu(x):
    return jnp.where(x >= 0, x, NEG_SLOPE * x)


def _round_up(n, m):
    return ((n + m - 1) // m) * m


# ---------------- Pallas kernels ---------------- #

def m3a_text_kernel(adj_ref, xt_ref, w1t_ref, w2t_ref, ytext_ref):
    """One-shot (no grid): TEXT relation learner.

    y_text = adj @ (LeakyReLU(adj @ (text_lexicon @ W1t)) @ W2t)      (Cp, Fp), f32
    Whole problem fits in VMEM; runs once per forward, so kept in f32.
    """
    adj = adj_ref[...]
    h = jnp.dot(adj,
                jnp.dot(xt_ref[...], w1t_ref[...],
                        preferred_element_type=jnp.float32),
                preferred_element_type=jnp.float32)
    h = _leaky_relu(h)
    ytext_ref[...] = jnp.dot(adj,
                             jnp.dot(h, w2t_ref[...],
                                     preferred_element_type=jnp.float32),
                             preferred_element_type=jnp.float32)


def m3a_batch_kernel(x_ref, w1r_ref, w2rs_ref, ytt_ref, out_ref):
    """One grid step = one batch tile. Operands bf16, MXU accumulation f32.

    x:    (TB, Fp) bf16   streamed per tile
    w1r:  (Fp, Hp) bf16   resident
    w2rs: (Hp, Cp) bf16   resident (already scaled by alpha)
    ytt:  (Fp, Cp) bf16   resident (y_text^T, lane-dense class axis)
    out:  (TB, Cp) f32    lane-dense store
    """
    x = x_ref[...]

    # RGB branch (collapsed): LeakyReLU(x @ W1_rgb) @ (alpha * W2_rgb)
    v = _leaky_relu(jnp.dot(x, w1r_ref[...], preferred_element_type=jnp.float32))
    rgb = jnp.dot(v.astype(jnp.bfloat16), w2rs_ref[...],
                  preferred_element_type=jnp.float32)

    # TEXT joint ('ADD'): x @ y_text^T  (plain NN matmul; RHS pre-transposed)
    text = jnp.dot(x, ytt_ref[...], preferred_element_type=jnp.float32)

    out_ref[...] = (rgb + text).astype(out_ref.dtype)


# ---------------- Wrapper ---------------- #

def m3a_joint_learning(x, adj, text_lexicon, params, *, batch_tile=512):
    B, F = x.shape
    C = adj.shape[0]
    T = text_lexicon.shape[1]
    H = params["w1_rgb"].shape[1]

    # Lane-dense padding of every contraction / output dim (zero padding is exact).
    Cp = _round_up(C, 128)
    Fp = _round_up(F, 128)
    Hp = _round_up(H, 128)
    Tp = _round_up(T, 128)

    f32 = jnp.float32
    adj_p = jnp.pad(adj.astype(f32), ((0, Cp - C), (0, Cp - C)))
    xt_p = jnp.pad(text_lexicon.astype(f32), ((0, Cp - C), (0, Tp - T)))
    w1t_p = jnp.pad(params["w1_text"].astype(f32), ((0, Tp - T), (0, Hp - H)))
    w2t_p = jnp.pad(params["w2_text"].astype(f32), ((0, Hp - H), (0, Fp - F)))
    w1r_p = jnp.pad(params["w1_rgb"].astype(f32), ((0, Fp - F), (0, Hp - H)))
    w2r_p = jnp.pad(params["w2_rgb"].astype(f32), ((0, Hp - H), (0, Cp - C)))

    # ---------- Batch-independent phase (hoisted out of the hot grid) ----------
    # TEXT relation learner: one-shot Pallas call (no grid; whole arrays in VMEM).
    y_text = pl.pallas_call(
        m3a_text_kernel,
        out_shape=jax.ShapeDtypeStruct((Cp, Fp), jnp.float32),
    )(adj_p, xt_p, w1t_p, w2t_p)
    # Transpose ONCE -> hot-loop uses a standard (TB,Fp)@(Fp,Cp) MXU matmul with a
    # lane-dense RHS.
    ytt = y_text.T.astype(jnp.bfloat16)                              # (Fp, Cp)

    # alpha = mean_i (adj @ rowsum(adj))_i over the TRUE C classes, computed without
    # touching the MXU:  (1/C) * sum_j colsum(adj)[j] * rowsum(adj)[j].
    # Precondition of the RGB collapse: adj >= 0 elementwise (true for this module's
    # thresholded/renormalized + symmetric-normalized adjacency). Padded rows/cols of
    # adj are zero-filled, so summing over Cp and dividing by the true C is exact.
    alpha = jnp.sum(jnp.sum(adj_p, axis=0) * jnp.sum(adj_p, axis=1)) * (1.0 / C)
    w2r_s = (w2r_p * alpha).astype(jnp.bfloat16)                     # alpha folded in
    w1r_b = w1r_p.astype(jnp.bfloat16)

    # ---------- Batch-tiled hot kernel ----------
    TB = min(batch_tile, _round_up(B, 16))       # 16: bf16 sublane packing
    B_pad = _round_up(B, TB)
    nb = B_pad // TB
    x_b = jnp.pad(x.astype(jnp.bfloat16), ((0, B_pad - B), (0, Fp - F)))

    out = pl.pallas_call(
        m3a_batch_kernel,
        grid=(nb,),
        out_shape=jax.ShapeDtypeStruct((B_pad, Cp), jnp.float32),
        in_specs=[
            pl.BlockSpec((TB, Fp), lambda b: (b, 0)),     # x: streamed per tile
            pl.BlockSpec((Fp, Hp), lambda b: (0, 0)),     # w1_rgb: resident
            pl.BlockSpec((Hp, Cp), lambda b: (0, 0)),     # alpha * w2_rgb: resident
            pl.BlockSpec((Fp, Cp), lambda b: (0, 0)),     # y_text^T: resident
        ],
        out_specs=pl.BlockSpec((TB, Cp), lambda b: (b, 0)),
        compiler_params=pltpu.CompilerParams(
            # No cross-step carry -> batch tiles are independent; on v7x the grid
            # shards across both TensorCores.
            dimension_semantics=("parallel",),
            vmem_limit_bytes=32 * 1024 * 1024,
        ),
    )(x_b, w1r_b, w2r_s, ytt)

    return out[:B, :C]


# ---------- Parameter / adjacency construction (glue, plain JAX) ---------- #

def make_graph_adj(key, num_classes, t=0.4):
    """Deterministic stand-in for get_graph_adj_matrix + get_graph_adj_input."""
    raw = jax.random.uniform(key, (num_classes, num_classes), jnp.float32)
    A = jnp.where(raw < t, 0.0, 1.0)
    A = A * 0.25 / (A.sum(0, keepdims=True) + 1e-6)
    A = A + jnp.eye(num_classes, dtype=jnp.float32)
    D = jnp.power(A.sum(1), -0.5)
    D = jnp.diag(D)
    return jnp.matmul(jnp.matmul(A, D).T, D)


def gcn_weight(key, din, dout):
    stdv = 1.0 / math.sqrt(dout)
    return jax.random.uniform(key, (din, dout), jnp.float32, -stdv, stdv)


# ---------- Pure-JAX reference (full, un-collapsed module semantics) ---------- #

def reference(x, adj, text_lexicon, params):
    B, F = x.shape
    C = adj.shape[0]
    x_rgb = jnp.broadcast_to(x[:, None, :], (B, C, F))
    h = jnp.einsum("ij,bjk->bik", adj, x_rgb @ params["w1_rgb"])
    h = _leaky_relu(h)
    y_rgb = jnp.einsum("ij,bjk->bik", adj, h @ params["w2_rgb"])
    rgb_out = y_rgb.mean(axis=1)

    ht = adj @ (text_lexicon @ params["w1_text"])
    ht = _leaky_relu(ht)
    y_text = adj @ (ht @ params["w2_text"])
    text_out = x @ y_text.T
    return rgb_out + text_out


if __name__ == "__main__":
    B, F, C, H, T = 2, 32, 16, 32, 32  # batch, feature_size, num_classes, hidden, text_vec

    key = jax.random.PRNGKey(0)
    ks = jax.random.split(key, 7)
    x = jax.random.normal(ks[0], (B, F), jnp.float32)
    adj = make_graph_adj(ks[1], C)
    text_lexicon = jax.random.normal(ks[2], (C, T), jnp.float32)
    params = {
        "w1_rgb": gcn_weight(ks[3], F, H),
        "w2_rgb": gcn_weight(ks[4], H, C),
        "w1_text": gcn_weight(ks[5], T, H),
        "w2_text": gcn_weight(ks[6], H, F),
    }

    out = m3a_joint_learning(x, adj, text_lexicon, params)
    out = jax.block_until_ready(out)

    ref = reference(x, adj, text_lexicon, params)
    assert out.shape == (B, C), out.shape
    # bf16 MXU operands (f32 accumulation) -> tolerance loosened vs. pure-f32 reference.
    assert jnp.allclose(out, ref, rtol=5e-2, atol=5e-2), float(jnp.max(jnp.abs(out - ref)))
    print("KERNEL_OK")
</pallas_src>

<mosaic_0001>
module attributes {stable_mosaic.version = 11 : i64} {
  func.func @m3a_text_kernel(%arg0: memref<128x128xf32, #tpu.memory_space<vmem>>, %arg1: memref<128x128xf32, #tpu.memory_space<vmem>>, %arg2: memref<128x128xf32, #tpu.memory_space<vmem>>, %arg3: memref<128x128xf32, #tpu.memory_space<vmem>>, %arg4: memref<128x128xf32, #tpu.memory_space<vmem>>) attributes {dimension_semantics = [], scalar_prefetch = 0 : i64, scratch_operands = 0 : i64, tpu.core_type = #tpu.core_type<tc>} {
    %c0 = arith.constant 0 : index
    %c0_0 = arith.constant 0 : index
    %0 = vector.load %arg0[%c0, %c0_0] : memref<128x128xf32, #tpu.memory_space<vmem>>, vector<128x128xf32>
    %c0_1 = arith.constant 0 : index
    %c0_2 = arith.constant 0 : index
    %1 = vector.load %arg1[%c0_1, %c0_2] : memref<128x128xf32, #tpu.memory_space<vmem>>, vector<128x128xf32>
    %c0_3 = arith.constant 0 : index
    %c0_4 = arith.constant 0 : index
    %2 = vector.load %arg2[%c0_3, %c0_4] : memref<128x128xf32, #tpu.memory_space<vmem>>, vector<128x128xf32>
    %cst = arith.constant dense<0.000000e+00> : vector<128x128xf32>
    %3 = tpu.matmul %1, %2, %cst {dimension_numbers = #tpu.dot_dimension_numbers<[1], [0], [0], [1], [0, 0, 1, 1], [], []>} : vector<128x128xf32>, vector<128x128xf32>, vector<128x128xf32> -> vector<128x128xf32>
    %cst_5 = arith.constant dense<0.000000e+00> : vector<128x128xf32>
    %4 = tpu.matmul %0, %3, %cst_5 {dimension_numbers = #tpu.dot_dimension_numbers<[1], [0], [0], [1], [0, 0, 1, 1], [], []>} : vector<128x128xf32>, vector<128x128xf32>, vector<128x128xf32> -> vector<128x128xf32>
    %cst_6 = arith.constant 0.000000e+00 : f32
    %5 = vector.broadcast %cst_6 : f32 to vector<128x128xf32>
    %6 = arith.cmpf oge, %4, %5 : vector<128x128xf32>
    %cst_7 = arith.constant 2.000000e-01 : f32
    %7 = vector.broadcast %cst_7 : f32 to vector<128x128xf32>
    %8 = arith.mulf %7, %4 : vector<128x128xf32>
    %9 = arith.select %6, %4, %8 : vector<128x128xi1>, vector<128x128xf32>
    %c0_8 = arith.constant 0 : index
    %c0_9 = arith.constant 0 : index
    %10 = vector.load %arg3[%c0_8, %c0_9] : memref<128x128xf32, #tpu.memory_space<vmem>>, vector<128x128xf32>
    %cst_10 = arith.constant dense<0.000000e+00> : vector<128x128xf32>
    %11 = tpu.matmul %9, %10, %cst_10 {dimension_numbers = #tpu.dot_dimension_numbers<[1], [0], [0], [1], [0, 0, 1, 1], [], []>} : vector<128x128xf32>, vector<128x128xf32>, vector<128x128xf32> -> vector<128x128xf32>
    %cst_11 = arith.constant dense<0.000000e+00> : vector<128x128xf32>
    %12 = tpu.matmul %0, %11, %cst_11 {dimension_numbers = #tpu.dot_dimension_numbers<[1], [0], [0], [1], [0, 0, 1, 1], [], []>} : vector<128x128xf32>, vector<128x128xf32>, vector<128x128xf32> -> vector<128x128xf32>
    %c0_12 = arith.constant 0 : index
    %c0_13 = arith.constant 0 : index
    %13 = vector.load %arg4[%c0_12, %c0_13] : memref<128x128xf32, #tpu.memory_space<vmem>>, vector<128x128xf32>
    tpu.vector_store %arg4[%c0_12, %c0_13], %12 {strides = array<i32>} : memref<128x128xf32, #tpu.memory_space<vmem>>, vector<128x128xf32>,
    return
  }
}

</mosaic_0001>

<bundles_post_ra>
// kernel: tpu_custom_call.1
= control target key start
LH: loop header
LB: loop body
LE: loop exit
PB: predicated region body
PF: predicated region fallthrough
CT: control target
= control target key end

     0   :  { %9 = vsyncpa [#allocation3], 0  ;;  %s1590_s0 = inlined_call_operand.hbm [shape: f32[128,128], index: 0, kind: input, shape index: {}]   ;;  %s1591_s1 = inlined_call_operand.hbm [shape: f32[128,128], index: 1, kind: input, shape index: {}]   ;;  %s1592_s2 = inlined_call_operand.hbm [shape: f32[128,128], index: 2, kind: input, shape index: {}]   ;;  %s1593_s3 = inlined_call_operand.hbm [shape: f32[128,128], index: 3, kind: input, shape index: {}]   ;;  %s1594_s4 = inlined_call_operand.hbm [shape: f32[128,128], index: 4, kind: output, shape index: {}]  }
   0x1   :  { %10 = vsyncpa [#allocation6], 0 }
   0x2   :  { %11 = vsyncpa [#allocation9], 0 }
   0x3   :  { %12 = vsyncpa [#allocation4], 0  ;;  %s1405_s15 = smov [#allocation5]   ;;  %s1406_s17 = smov [#allocation2]  }
   0x4   :  { %s30_s16 = sshll.u32 %s1405_s15, 4  ;;  %s18_s18 = sshll.u32 %s1406_s17, 4  ;;  %s31_s16 = int_to_ptr.vmem [resolvable:$true] %s30_s16  ;;  %s1437_s18 = int_to_ptr.vmem [resolvable:$true] %s18_s18 }
   0x5   :  { %s1287_s21 = scalar_lea.hbm %s1591_s1, 2048 }
   0x6   :  { %p1288_p0 = scmp.ne.s32.totalorder %s1591_s1, %s1287_s21  ;;  %p1291_p1 = scmp.lt.u32.totalorder %s1287_s21, %s1591_s1 }
   0x8   :  { %p1293_p2 = pnand %p1291_p1, %p1288_p0 }
   0xa   :  { %1296 = shalt.err (!%p1293_p2)
}
   0xb   :  { %s1297_s26 = scalar_lea.vmem %s31_s16, 2048  ;;  %p1302_p4 = scmp.lt.s32.totalorder %s31_s16, %s31_s16 }
   0xc   :  { %p1298_p3 = scmp.ne.s32.totalorder %s31_s16, %s1297_s26  ;;  %p1303_p5 = scmp.lt.s32.totalorder %s1297_s26, %s1297_s26 }
   0xe   :  { %p1304_p6 = por %p1303_p5, %p1302_p4 }
  0x10   :  { %p1305_p7 = pnand %p1304_p6, %p1298_p3 }
  0x12   :  { %1308 = shalt.err (!%p1305_p7)
}
  0x13   :  { %s1407_s27 = smov 128   ;;  %s1408_s28 = smov 8  }
  0x14   :  { %36 = dma.hbm_to_vmem [thread:$0]  %s1591_s1, 2048, %s31_s16, [#allocation6], %s1407_s27, %s1407_s27, %s1408_s28  }
  0x15   :  { %s1309_s7 = scalar_lea.hbm %s1590_s0, 2048 }
  0x16   :  { %p1310_p8 = scmp.ne.s32.totalorder %s1590_s0, %s1309_s7  ;;  %p1313_p9 = scmp.lt.u32.totalorder %s1309_s7, %s1590_s0 }
  0x18   :  { %p1315_p10 = pnand %p1313_p9, %p1310_p8 }
  0x1a   :  { %1318 = shalt.err (!%p1315_p10)
}
  0x1b   :  { %s1319_s12 = scalar_lea.vmem %s1437_s18, 2048  ;;  %p1324_p12 = scmp.lt.s32.totalorder %s1437_s18, %s1437_s18 }
  0x1c   :  { %p1320_p11 = scmp.ne.s32.totalorder %s1437_s18, %s1319_s12  ;;  %p1325_p13 = scmp.lt.s32.totalorder %s1319_s12, %s1319_s12 }
  0x1e   :  { %p1326_p0 = por %p1325_p13, %p1324_p12 }
  0x20   :  { %p1327_p1 = pnand %p1326_p0, %p1320_p11 }
  0x22   :  { %1330 = shalt.err (!%p1327_p1)
}
  0x23   :  { %24 = dma.hbm_to_vmem [thread:$0]  %s1590_s0, 2048, %s1437_s18, [#allocation3], %s1407_s27, %s1407_s27, %s1408_s28  }
  0x24   :  { %s1409_s14 = smov [#allocation7]   ;;  %s1410_s16 = smov [#allocation8]  }
  0x25   :  { %s42_s15 = sshll.u32 %s1409_s14, 4  ;;  %s54_s17 = sshll.u32 %s1410_s16, 4  ;;  %s43_s15 = int_to_ptr.vmem [resolvable:$true] %s42_s15  ;;  %s1474_s17 = int_to_ptr.vmem [resolvable:$true] %s54_s17 }
  0x26   :  { %s1331_s21 = scalar_lea.hbm %s1592_s2, 2048 }
  0x27   :  { %p1332_p2 = scmp.ne.s32.totalorder %s1592_s2, %s1331_s21  ;;  %p1335_p3 = scmp.lt.u32.totalorder %s1331_s21, %s1592_s2 }
  0x29   :  { %p1337_p4 = pnand %p1335_p3, %p1332_p2 }
  0x2b   :  { %1340 = shalt.err (!%p1337_p4)
}
  0x2c   :  { %s1341_s0 = scalar_lea.vmem %s43_s15, 2048  ;;  %p1346_p6 = scmp.lt.s32.totalorder %s43_s15, %s43_s15 }
  0x2d   :  { %p1342_p5 = scmp.ne.s32.totalorder %s43_s15, %s1341_s0  ;;  %p1347_p7 = scmp.lt.s32.totalorder %s1341_s0, %s1341_s0 }
  0x2f   :  { %p1348_p8 = por %p1347_p7, %p1346_p6 }
  0x31   :  { %p1349_p9 = pnand %p1348_p8, %p1342_p5 }
  0x33   :  { %1352 = shalt.err (!%p1349_p9)
}
  0x34   :  { %48 = dma.hbm_to_vmem [thread:$0]  %s1592_s2, 2048, %s43_s15, [#allocation6], %s1407_s27, %s1407_s27, %s1408_s28  }
  0x35   :  { %s1353_s5 = scalar_lea.hbm %s1593_s3, 2048 }
  0x36   :  { %p1354_p10 = scmp.ne.s32.totalorder %s1593_s3, %s1353_s5  ;;  %p1357_p11 = scmp.lt.u32.totalorder %s1353_s5, %s1593_s3 }
  0x38   :  { %p1359_p12 = pnand %p1357_p11, %p1354_p10 }
  0x3a   :  { %1362 = shalt.err (!%p1359_p12)
}
  0x3b   :  { %s1363_s10 = scalar_lea.vmem %s1474_s17, 2048  ;;  %p1368_p0 = scmp.lt.s32.totalorder %s1474_s17, %s1474_s17 }
  0x3c   :  { %p1364_p13 = scmp.ne.s32.totalorder %s1474_s17, %s1363_s10  ;;  %p1369_p1 = scmp.lt.s32.totalorder %s1363_s10, %s1363_s10 }
  0x3e   :  { %p1370_p2 = por %p1369_p1, %p1368_p0 }
  0x40   :  { %p1371_p3 = pnand %p1370_p2, %p1364_p13 }
  0x42   :  { %1374 = shalt.err (!%p1371_p3)
}
  0x43   :  { %60 = dma.hbm_to_vmem [thread:$0]  %s1593_s3, 2048, %s1474_s17, [#allocation9], %s1407_s27, %s1407_s27, %s1408_s28  }
  0x44   :  { %1397 = dma.done.wait [#allocation3], 2048  }
  0x45   :  { %1398 = vsyncadd [#allocation3], 4294965248 }
  0x46   :  { %1399 = dma.done.wait [#allocation6], 4096  }
  0x47   :  { %1400 = vsyncadd [#allocation6], 4294963200 }
  0x48   :  { %1401 = dma.done.wait [#allocation9], 2048  }
  0x49   :  { %1402 = vsyncadd [#allocation9], 4294965248  ;;  %v105_v0 = vld [vmem:[#allocation7] sm:$0xff]  ;;  %v106_v1 = vld [vmem:[#allocation7 + $0x8] sm:$0xff]  ;;  %s1411_s3 = smov [#allocation10]  }
  0x4a   :  { %v107_v2 = vld [vmem:[#allocation7 + $0x10] sm:$0xff]  ;;  %v1152_v3 = vpack.c.bf16 %v106_v1, %v105_v0  ;;  %v108_v4 = vld [vmem:[#allocation7 + $0x18] sm:$0xff]  ;;  %v109_v6 = vld [vmem:[#allocation7 + $0x20] sm:$0xff]  ;;  %s786_s12 = sshll.u32 %s1411_s3, 4  ;;  %s787_s12 = int_to_ptr.vmem [resolvable:$true] %s786_s12 }
  0x4b   :  { %v1156_v5 = vpack.c.bf16 %v108_v4, %v107_v2  ;;  %v110_v7 = vld [vmem:[#allocation7 + $0x28] sm:$0xff]  ;;  %v89_v9 = vld [vmem:[#allocation5] sm:$0xff]  ;;  %v111_v10 = vld [vmem:[#allocation7 + $0x30] sm:$0xff]  ;;  %s1375_s1 = scalar_lea.vmem %s787_s12, 2048  ;;  %p1380_p5 = scmp.lt.s32.totalorder %s787_s12, %s787_s12 }
  0x4c   :  { %1153 = vmatprep.subr.bf16.mxu0 %v1152_v3  ;;  %v1160_v8 = vpack.c.bf16 %v110_v7, %v109_v6  ;;  %v112_v11 = vld [vmem:[#allocation7 + $0x38] sm:$0xff]  ;;  %960 = vmatprep.mubr.f32.mxu0 %v89_v9  ;;  %v113_v13 = vld [vmem:[#allocation7 + $0x40] sm:$0xff]  ;;  %v114_v14 = vld [vmem:[#allocation7 + $0x48] sm:$0xff]  ;;  %p1376_p4 = scmp.ne.s32.totalorder %s787_s12, %s1375_s1  ;;  %p1381_p6 = scmp.lt.s32.totalorder %s1375_s1, %s1375_s1 }
  0x4d   :  { %1155 = vmatpush3.bf16.msra.mxu0 %v1152_v3  ;;  %v1164_v12 = vpack.c.bf16 %v112_v11, %v111_v10  ;;  %v1168_v15 = vpack.c.bf16 %v114_v14, %v113_v13  ;;  %v115_v16 = vld [vmem:[#allocation7 + $0x50] sm:$0xff]  ;;  %v116_v17 = vld [vmem:[#allocation7 + $0x58] sm:$0xff]  ;;  %v117_v19 = vld [vmem:[#allocation7 + $0x60] sm:$0xff] }
  0x4e   :  { %1157 = vmatprep.subr.bf16.mxu0 %v1156_v5  ;;  %v1172_v18 = vpack.c.bf16 %v116_v17, %v115_v16  ;;  %v118_v20 = vld [vmem:[#allocation7 + $0x68] sm:$0xff]  ;;  %v119_v22 = vld [vmem:[#allocation7 + $0x70] sm:$0xff]  ;;  %v120_v23 = vld [vmem:[#allocation7 + $0x78] sm:$0xff]  ;;  %p1382_p7 = por %p1381_p6, %p1380_p5 }
  0x4f   :  { %v1176_v21 = vpack.c.bf16 %v118_v20, %v117_v19  ;;  %v1180_v24 = vpack.c.bf16 %v120_v23, %v119_v22  ;;  %v90_v25 = vld [vmem:[#allocation5 + $0x8] sm:$0xff]  ;;  %v91_v26 = vld [vmem:[#allocation5 + $0x10] sm:$0xff]  ;;  %v92_v27 = vld [vmem:[#allocation5 + $0x18] sm:$0xff] }
  0x50   :  { %v93_v28 = vld [vmem:[#allocation5 + $0x20] sm:$0xff]  ;;  %v94_v29 = vld [vmem:[#allocation5 + $0x28] sm:$0xff]  ;;  %v95_v30 = vld [vmem:[#allocation5 + $0x30] sm:$0xff]  ;;  %p1383_p8 = pnand %p1382_p7, %p1376_p4 }
  0x51   :  { %1159 = vmatpush3.bf16.msra.mxu0 %v1156_v5  ;;  %v96_v31 = vld [vmem:[#allocation5 + $0x38] sm:$0xff]  ;;  %v97_v32 = vld [vmem:[#allocation5 + $0x40] sm:$0xff]  ;;  %v98_v33 = vld [vmem:[#allocation5 + $0x48] sm:$0xff] }
  0x52   :  { %1161 = vmatprep.subr.bf16.mxu0 %v1160_v8  ;;  %v99_v34 = vld [vmem:[#allocation5 + $0x50] sm:$0xff]  ;;  %v100_v35 = vld [vmem:[#allocation5 + $0x58] sm:$0xff]  ;;  %v101_v36 = vld [vmem:[#allocation5 + $0x60] sm:$0xff] }
  0x53   :  { %v102_v37 = vld [vmem:[#allocation5 + $0x68] sm:$0xff]  ;;  %v103_v38 = vld [vmem:[#allocation5 + $0x70] sm:$0xff]  ;;  %v104_v39 = vld [vmem:[#allocation5 + $0x78] sm:$0xff] }
  0x54   :  { %v1511_v40 = vld [vmem:[#allocation2] sm:$0xff]  ;;  %v460_v42 = vld [vmem:[#allocation8 + $0x8] sm:$0xff]  ;;  %v461_v43 = vld [vmem:[#allocation8 + $0x10] sm:$0xff] }
  0x55   :  { %1163 = vmatpush3.bf16.msra.mxu0 %v1160_v8  ;;  %1016 = vmatprep.mubr.f32.mxu1 %v1511_v40  ;;  %v459_v41 = vld [vmem:[#allocation8] sm:$0xff]  ;;  %v462_v45 = vld [vmem:[#allocation8 + $0x18] sm:$0xff]  ;;  %v464_v48 = vld [vmem:[#allocation8 + $0x28] sm:$0xff] }
  0x56   :  { %1165 = vmatprep.subr.bf16.mxu0 %v1164_v12  ;;  %v1216_v44 = vpack.c.bf16 %v460_v42, %v459_v41  ;;  %v1220_v46 = vpack.c.bf16 %v462_v45, %v461_v43  ;;  %v463_v47 = vld [vmem:[#allocation8 + $0x20] sm:$0xff]  ;;  %v465_v50 = vld [vmem:[#allocation8 + $0x30] sm:$0xff]  ;;  %v466_v51 = vld [vmem:[#allocation8 + $0x38] sm:$0xff] }
  0x57   :  { %v1224_v49 = vpack.c.bf16 %v464_v48, %v463_v47  ;;  %v1228_v52 = vpack.c.bf16 %v466_v51, %v465_v50  ;;  %v467_v53 = vld [vmem:[#allocation8 + $0x40] sm:$0xff]  ;;  %v468_v54 = vld [vmem:[#allocation8 + $0x48] sm:$0xff]  ;;  %v469_v56 = vld [vmem:[#allocation8 + $0x50] sm:$0xff] }
  0x58   :  { %v1232_v55 = vpack.c.bf16 %v468_v54, %v467_v53  ;;  %v470_v57 = vld [vmem:[#allocation8 + $0x58] sm:$0xff]  ;;  %v471_v59 = vld [vmem:[#allocation8 + $0x60] sm:$0xff]  ;;  %v472_v60 = vld [vmem:[#allocation8 + $0x68] sm:$0xff] }
  0x59   :  { %1167 = vmatpush3.bf16.msra.mxu0 %v1164_v12  ;;  %v1236_v58 = vpack.c.bf16 %v470_v57, %v469_v56  ;;  %v1240_v61 = vpack.c.bf16 %v472_v60, %v471_v59  ;;  %v1514_v22 = vld [vmem:[#allocation2 + $0x8] sm:$0xff]  ;;  %v1516_v23 = vld [vmem:[#allocation2 + $0x10] sm:$0xff] }
  0x5a   :  { %1169 = vmatprep.subr.bf16.mxu0 %v1168_v15 }
  0x5d   :  { %1171 = vmatpush3.bf16.msra.mxu0 %v1168_v15 }
  0x5e   :  { %1173 = vmatprep.subr.bf16.mxu0 %v1172_v18 }
  0x61   :  { %1175 = vmatpush3.bf16.msra.mxu0 %v1172_v18 }
  0x62   :  { %1177 = vmatprep.subr.bf16.mxu0 %v1176_v21 }
  0x65   :  { %1179 = vmatpush3.bf16.msra.mxu0 %v1176_v21 }
  0x66   :  { %1181 = vmatprep.subr.bf16.mxu0 %v1180_v24 }
  0x69   :  { %1183 = vmatpush3.bf16.msra.mxu0 %v1180_v24  ;;  %v1520_v24 = vld [vmem:[#allocation2 + $0x18] sm:$0xff] }
  0x6a   :  { %1217 = vmatprep.subr.bf16.mxu0 %v1216_v44 }
  0x6c   :  { %961 = vmatmul.mubr.f32.vlgmr.msra.gmra.mrb[0].mxu0 %v90_v25  ;;  %v1522_v25 = vld [vmem:[#allocation2 + $0x20] sm:$0xff] }
  0x6d   :  { %963 = vmatprep.mubr.f32.mxu0 %v91_v26  ;;  %1219 = vmatpush3.bf16.msra.mxu0 %v1216_v44  ;;  %v1526_v26 = vld [vmem:[#allocation2 + $0x28] sm:$0xff] }
  0x6e   :  { %1221 = vmatprep.subr.bf16.mxu0 %v1220_v46 }
  0x70   :  { %964 = vmatmul.mubr.f32.gmra.mrb[2].mxu0 %v92_v27  ;;  %v1528_v27 = vld [vmem:[#allocation2 + $0x30] sm:$0xff] }
  0x71   :  { %966 = vmatprep.mubr.f32.mxu0 %v93_v28  ;;  %1223 = vmatpush3.bf16.msra.mxu0 %v1220_v46  ;;  %v1532_v28 = vld [vmem:[#allocation2 + $0x38] sm:$0xff] }
  0x72   :  { %1225 = vmatprep.subr.bf16.mxu0 %v1224_v49 }
  0x74   :  { %967 = vmatmul.mubr.f32.gmra.mrb[4].mxu0 %v94_v29  ;;  %v1534_v29 = vld [vmem:[#allocation2 + $0x40] sm:$0xff] }
  0x75   :  { %969 = vmatprep.mubr.f32.mxu0 %v95_v30  ;;  %1227 = vmatpush3.bf16.msra.mxu0 %v1224_v49  ;;  %v1538_v30 = vld [vmem:[#allocation2 + $0x48] sm:$0xff] }
  0x76   :  { %1229 = vmatprep.subr.bf16.mxu0 %v1228_v52 }
  0x78   :  { %970 = vmatmul.mubr.f32.gmra.mrb[6].mxu0 %v96_v31  ;;  %v1540_v31 = vld [vmem:[#allocation2 + $0x50] sm:$0xff] }
  0x79   :  { %972 = vmatprep.mubr.f32.mxu0 %v97_v32  ;;  %1231 = vmatpush3.bf16.msra.mxu0 %v1228_v52  ;;  %v1544_v32 = vld [vmem:[#allocation2 + $0x58] sm:$0xff] }
  0x7a   :  { %1233 = vmatprep.subr.bf16.mxu0 %v1232_v55 }
  0x7c   :  { %973 = vmatmul.mubr.f32.gmra.mrb[8].mxu0 %v98_v33  ;;  %v1546_v33 = vld [vmem:[#allocation2 + $0x60] sm:$0xff] }
  0x7d   :  { %975 = vmatprep.mubr.f32.mxu0 %v99_v34  ;;  %1235 = vmatpush3.bf16.msra.mxu0 %v1232_v55  ;;  %v1550_v34 = vld [vmem:[#allocation2 + $0x68] sm:$0xff] }
  0x7e   :  { %1237 = vmatprep.subr.bf16.mxu0 %v1236_v58 }
  0x80   :  { %976 = vmatmul.mubr.f32.gmra.mrb[10].mxu0 %v100_v35  ;;  %v1552_v35 = vld [vmem:[#allocation2 + $0x70] sm:$0xff] }
  0x81   :  { %978 = vmatprep.mubr.f32.mxu0 %v101_v36  ;;  %1239 = vmatpush3.bf16.msra.mxu0 %v1236_v58  ;;  %v1556_v36 = vld [vmem:[#allocation2 + $0x78] sm:$0xff] }
  0x82   :  { %1241 = vmatprep.subr.bf16.mxu0 %v1240_v61 }
  0x84   :  { %979 = vmatmul.mubr.f32.gmra.mrb[12].mxu0 %v102_v37  ;;  %v473_v37 = vld [vmem:[#allocation8 + $0x70] sm:$0xff] }
  0x85   :  { %981 = vmatprep.mubr.f32.mxu0 %v103_v38  ;;  %1243 = vmatpush3.bf16.msra.mxu0 %v1240_v61  ;;  %v474_v38 = vld [vmem:[#allocation8 + $0x78] sm:$0xff] }
  0x88   :  { %982 = vmatmul.mubr.f32.gmra.mrb[14].mxu0 %v104_v39  ;;  %v1244_v39 = vpack.c.bf16 %v474_v38, %v473_v37 }
  0x8a   :  { %1245 = vmatprep.subr.bf16.mxu0 %v1244_v39 }
  0x8b   :  { %1247 = vmatpush3.bf16.msra.mxu0 %v1244_v39 }
 0x13f   :  { %v962_v62 = vpop.f32.mrb[0].mxu0 }
 0x140   :  { %v187_v63 = vpop.f32.mrb[1].mxu0 }
 0x141   :  { %v1184_v0 = vpack.c.bf16 %v962_v62, %v187_v63 }
 0x143   :  { %v965_v1 = vpop.f32.mrb[2].mxu0  ;;  %1185 = vmatprep.subr.bf16.mxu1 %v1184_v0 }
 0x144   :  { %v197_v2 = vpop.f32.mrb[3].mxu0  ;;  %1187 = vmatpush3.bf16.msra.mxu1 %v1184_v0 }
 0x145   :  { %v1188_v3 = vpack.c.bf16 %v965_v1, %v197_v2 }
 0x147   :  { %v968_v4 = vpop.f32.mrb[4].mxu0  ;;  %1189 = vmatprep.subr.bf16.mxu1 %v1188_v3 }
 0x148   :  { %v207_v5 = vpop.f32.mrb[5].mxu0  ;;  %1191 = vmatpush3.bf16.msra.mxu1 %v1188_v3 }
 0x149   :  { %v1192_v6 = vpack.c.bf16 %v968_v4, %v207_v5 }
 0x14b   :  { %v971_v7 = vpop.f32.mrb[6].mxu0  ;;  %1193 = vmatprep.subr.bf16.mxu1 %v1192_v6 }
 0x14c   :  { %v217_v8 = vpop.f32.mrb[7].mxu0  ;;  %1195 = vmatpush3.bf16.msra.mxu1 %v1192_v6 }
 0x14d   :  { %v1196_v9 = vpack.c.bf16 %v971_v7, %v217_v8 }
 0x14f   :  { %v974_v10 = vpop.f32.mrb[8].mxu0  ;;  %1197 = vmatprep.subr.bf16.mxu1 %v1196_v9 }
 0x150   :  { %v227_v11 = vpop.f32.mrb[9].mxu0  ;;  %1199 = vmatpush3.bf16.msra.mxu1 %v1196_v9 }
 0x151   :  { %v1200_v12 = vpack.c.bf16 %v974_v10, %v227_v11 }
 0x153   :  { %v977_v13 = vpop.f32.mrb[10].mxu0  ;;  %1201 = vmatprep.subr.bf16.mxu1 %v1200_v12 }
 0x154   :  { %v237_v14 = vpop.f32.mrb[11].mxu0  ;;  %1203 = vmatpush3.bf16.msra.mxu1 %v1200_v12 }
 0x155   :  { %v1204_v15 = vpack.c.bf16 %v977_v13, %v237_v14 }
 0x157   :  { %v980_v16 = vpop.f32.mrb[12].mxu0  ;;  %1205 = vmatprep.subr.bf16.mxu1 %v1204_v15 }
 0x158   :  { %v247_v17 = vpop.f32.mrb[13].mxu0  ;;  %1207 = vmatpush3.bf16.msra.mxu1 %v1204_v15 }
 0x159   :  { %v1208_v18 = vpack.c.bf16 %v980_v16, %v247_v17 }
 0x15b   :  { %v983_v19 = vpop.f32.mrb[14].mxu0  ;;  %1209 = vmatprep.subr.bf16.mxu1 %v1208_v18 }
 0x15c   :  { %v257_v20 = vpop.f32.mrb[15].mxu0  ;;  %1211 = vmatpush3.bf16.msra.mxu1 %v1208_v18 }
 0x15d   :  { %v1212_v21 = vpack.c.bf16 %v983_v19, %v257_v20 }
 0x15f   :  { %1213 = vmatprep.subr.bf16.mxu1 %v1212_v21 }
 0x160   :  { %1215 = vmatpush3.bf16.msra.mxu1 %v1212_v21 }
 0x163   :  { %1017 = vmatmul.mubr.f32.vlgmr.msra.gmra.mrb[0].mxu1 %v1514_v22 }
 0x164   :  { %1019 = vmatprep.mubr.f32.mxu1 %v1516_v23 }
 0x167   :  { %1020 = vmatmul.mubr.f32.gmra.mrb[2].mxu1 %v1520_v24 }
 0x168   :  { %1022 = vmatprep.mubr.f32.mxu1 %v1522_v25 }
 0x16b   :  { %1023 = vmatmul.mubr.f32.gmra.mrb[4].mxu1 %v1526_v26 }
 0x16c   :  { %1025 = vmatprep.mubr.f32.mxu1 %v1528_v27 }
 0x16f   :  { %1026 = vmatmul.mubr.f32.gmra.mrb[6].mxu1 %v1532_v28 }
 0x170   :  { %1028 = vmatprep.mubr.f32.mxu1 %v1534_v29 }
 0x173   :  { %1029 = vmatmul.mubr.f32.gmra.mrb[8].mxu1 %v1538_v30 }
 0x174   :  { %1031 = vmatprep.mubr.f32.mxu1 %v1540_v31 }
 0x177   :  { %1032 = vmatmul.mubr.f32.gmra.mrb[10].mxu1 %v1544_v32 }
 0x178   :  { %1034 = vmatprep.mubr.f32.mxu1 %v1546_v33 }
 0x17b   :  { %1035 = vmatmul.mubr.f32.gmra.mrb[12].mxu1 %v1550_v34 }
 0x17c   :  { %1037 = vmatprep.mubr.f32.mxu1 %v1552_v35 }
 0x17f   :  { %1038 = vmatmul.mubr.f32.gmra.mrb[14].mxu1 %v1556_v36 }
 0x180   :  { %1128 = vmatprep.mubr.f32.mxu1 %v1511_v40 }
 0x236   :  { %v1018_v41 = vpop.f32.mrb[0].mxu1 }
 0x237   :  { %v428_v42 = vmul.f32 0.2, %v1018_v41  ;;  %v332_v43 = vpop.f32.mrb[1].mxu1  ;;  %vm412_vm0 = vcmp.ge.f32.partialorder %v1018_v41, 0.0 }
 0x238   :  { %vm411_vm1 = vcmp.ge.f32.partialorder %v332_v43, 0.0  ;;  %v427_v44 = vmul.f32 0.2, %v332_v43 }
 0x239   :  { %v444_v47 = vsel %vm412_vm0, %v1018_v41, %v428_v42 }
 0x23a   :  { %v1021_v45 = vpop.f32.mrb[2].mxu1  ;;  %v443_v46 = vsel %vm411_vm1, %v332_v43, %v427_v44 }
 0x23b   :  { %v430_v48 = vmul.f32 0.2, %v1021_v45  ;;  %v342_v49 = vpop.f32.mrb[3].mxu1  ;;  %1072 = vmatprep.mubr.f32.mxu0 %v443_v46  ;;  %vm414_vm2 = vcmp.ge.f32.partialorder %v1021_v45, 0.0 }
 0x23c   :  { %vm413_vm3 = vcmp.ge.f32.partialorder %v342_v49, 0.0  ;;  %v429_v40 = vmul.f32 0.2, %v342_v49  ;;  %1073 = vmatmul.mubr.f32.vlgmr.msra.gmra.mrb[16].mxu0 %v444_v47 }
 0x23d   :  { %v446_v54 = vsel %vm414_vm2, %v1021_v45, %v430_v48 }
 0x23e   :  { %v1024_v50 = vpop.f32.mrb[4].mxu1  ;;  %v445_v51 = vsel %vm413_vm3, %v342_v49, %v429_v40 }
 0x23f   :  { %v432_v52 = vmul.f32 0.2, %v1024_v50  ;;  %v352_v53 = vpop.f32.mrb[5].mxu1  ;;  %1075 = vmatprep.mubr.f32.mxu0 %v445_v51  ;;  %vm416_vm4 = vcmp.ge.f32.partialorder %v1024_v50, 0.0 }
 0x240   :  { %vm415_vm5 = vcmp.ge.f32.partialorder %v352_v53, 0.0  ;;  %v431_v55 = vmul.f32 0.2, %v352_v53  ;;  %1076 = vmatmul.mubr.f32.gmra.mrb[18].mxu0 %v446_v54 }
 0x241   :  { %v448_v60 = vsel %vm416_vm4, %v1024_v50, %v432_v52 }
 0x242   :  { %v1027_v56 = vpop.f32.mrb[6].mxu1  ;;  %v447_v57 = vsel %vm415_vm5, %v352_v53, %v431_v55 }
 0x243   :  { %v434_v58 = vmul.f32 0.2, %v1027_v56  ;;  %v362_v59 = vpop.f32.mrb[7].mxu1  ;;  %1078 = vmatprep.mubr.f32.mxu0 %v447_v57  ;;  %vm418_vm6 = vcmp.ge.f32.partialorder %v1027_v56, 0.0 }
 0x244   :  { %vm417_vm7 = vcmp.ge.f32.partialorder %v362_v59, 0.0  ;;  %v433_v61 = vmul.f32 0.2, %v362_v59  ;;  %1079 = vmatmul.mubr.f32.gmra.mrb[20].mxu0 %v448_v60 }
 0x245   :  { %v450_v2 = vsel %vm418_vm6, %v1027_v56, %v434_v58 }
 0x246   :  { %v1030_v62 = vpop.f32.mrb[8].mxu1  ;;  %v449_v63 = vsel %vm417_vm7, %v362_v59, %v433_v61 }
 0x247   :  { %v436_v0 = vmul.f32 0.2, %v1030_v62  ;;  %v372_v1 = vpop.f32.mrb[9].mxu1  ;;  %1081 = vmatprep.mubr.f32.mxu0 %v449_v63  ;;  %vm420_vm8 = vcmp.ge.f32.partialorder %v1030_v62, 0.0 }
 0x248   :  { %vm419_vm9 = vcmp.ge.f32.partialorder %v372_v1, 0.0  ;;  %v435_v3 = vmul.f32 0.2, %v372_v1  ;;  %1082 = vmatmul.mubr.f32.gmra.mrb[22].mxu0 %v450_v2 }
 0x249   :  { %v452_v8 = vsel %vm420_vm8, %v1030_v62, %v436_v0 }
 0x24a   :  { %v1033_v4 = vpop.f32.mrb[10].mxu1  ;;  %v451_v5 = vsel %vm419_vm9, %v372_v1, %v435_v3 }
 0x24b   :  { %v438_v6 = vmul.f32 0.2, %v1033_v4  ;;  %v382_v7 = vpop.f32.mrb[11].mxu1  ;;  %1084 = vmatprep.mubr.f32.mxu0 %v451_v5  ;;  %vm422_vm10 = vcmp.ge.f32.partialorder %v1033_v4, 0.0 }
 0x24c   :  { %vm421_vm11 = vcmp.ge.f32.partialorder %v382_v7, 0.0  ;;  %v437_v9 = vmul.f32 0.2, %v382_v7  ;;  %1085 = vmatmul.mubr.f32.gmra.mrb[24].mxu0 %v452_v8 }
 0x24d   :  { %v454_v14 = vsel %vm422_vm10, %v1033_v4, %v438_v6 }
 0x24e   :  { %v1036_v10 = vpop.f32.mrb[12].mxu1  ;;  %v453_v11 = vsel %vm421_vm11, %v382_v7, %v437_v9 }
 0x24f   :  { %v440_v12 = vmul.f32 0.2, %v1036_v10  ;;  %v392_v13 = vpop.f32.mrb[13].mxu1  ;;  %1087 = vmatprep.mubr.f32.mxu0 %v453_v11  ;;  %vm424_vm12 = vcmp.ge.f32.partialorder %v1036_v10, 0.0 }
 0x250   :  { %vm423_vm13 = vcmp.ge.f32.partialorder %v392_v13, 0.0  ;;  %v439_v15 = vmul.f32 0.2, %v392_v13  ;;  %1088 = vmatmul.mubr.f32.gmra.mrb[26].mxu0 %v454_v14 }
 0x251   :  { %v456_v20 = vsel %vm424_vm12, %v1036_v10, %v440_v12 }
 0x252   :  { %v1039_v16 = vpop.f32.mrb[14].mxu1  ;;  %v455_v17 = vsel %vm423_vm13, %v392_v13, %v439_v15 }
 0x253   :  { %v442_v18 = vmul.f32 0.2, %v1039_v16  ;;  %v402_v19 = vpop.f32.mrb[15].mxu1  ;;  %1090 = vmatprep.mubr.f32.mxu0 %v455_v17  ;;  %vm426_vm14 = vcmp.ge.f32.partialorder %v1039_v16, 0.0 }
 0x254   :  { %vm425_vm15 = vcmp.ge.f32.partialorder %v402_v19, 0.0  ;;  %v441_v21 = vmul.f32 0.2, %v402_v19  ;;  %1091 = vmatmul.mubr.f32.gmra.mrb[28].mxu0 %v456_v20 }
 0x255   :  { %v458_v38 = vsel %vm426_vm14, %v1039_v16, %v442_v18 }
 0x256   :  { %v457_v37 = vsel %vm425_vm15, %v402_v19, %v441_v21 }
 0x257   :  { %1093 = vmatprep.mubr.f32.mxu0 %v457_v37 }
 0x258   :  { %1094 = vmatmul.mubr.f32.gmra.mrb[30].mxu0 %v458_v38 }
 0x30f   :  { %v1074_v39 = vpop.f32.mrb[16].mxu0 }
 0x310   :  { %v541_v41 = vpop.f32.mrb[17].mxu0 }
 0x311   :  { %v1248_v42 = vpack.c.bf16 %v1074_v39, %v541_v41 }
 0x313   :  { %v1077_v43 = vpop.f32.mrb[18].mxu0  ;;  %1249 = vmatprep.subr.bf16.mxu1 %v1248_v42 }
 0x314   :  { %v551_v44 = vpop.f32.mrb[19].mxu0  ;;  %1251 = vmatpush3.bf16.msra.mxu1 %v1248_v42 }
 0x315   :  { %v1252_v45 = vpack.c.bf16 %v1077_v43, %v551_v44 }
 0x317   :  { %v1080_v46 = vpop.f32.mrb[20].mxu0  ;;  %1253 = vmatprep.subr.bf16.mxu1 %v1252_v45 }
 0x318   :  { %v561_v47 = vpop.f32.mrb[21].mxu0  ;;  %1255 = vmatpush3.bf16.msra.mxu1 %v1252_v45 }
 0x319   :  { %v1256_v48 = vpack.c.bf16 %v1080_v46, %v561_v47 }
 0x31b   :  { %v1083_v49 = vpop.f32.mrb[22].mxu0  ;;  %1257 = vmatprep.subr.bf16.mxu1 %v1256_v48 }
 0x31c   :  { %v571_v40 = vpop.f32.mrb[23].mxu0  ;;  %1259 = vmatpush3.bf16.msra.mxu1 %v1256_v48 }
 0x31d   :  { %v1260_v50 = vpack.c.bf16 %v1083_v49, %v571_v40 }
 0x31f   :  { %v1086_v51 = vpop.f32.mrb[24].mxu0  ;;  %1261 = vmatprep.subr.bf16.mxu1 %v1260_v50 }
 0x320   :  { %v581_v52 = vpop.f32.mrb[25].mxu0  ;;  %1263 = vmatpush3.bf16.msra.mxu1 %v1260_v50 }
 0x321   :  { %v1264_v53 = vpack.c.bf16 %v1086_v51, %v581_v52 }
 0x323   :  { %v1089_v54 = vpop.f32.mrb[26].mxu0  ;;  %1265 = vmatprep.subr.bf16.mxu1 %v1264_v53 }
 0x324   :  { %v591_v55 = vpop.f32.mrb[27].mxu0  ;;  %1267 = vmatpush3.bf16.msra.mxu1 %v1264_v53 }
 0x325   :  { %v1268_v56 = vpack.c.bf16 %v1089_v54, %v591_v55 }
 0x327   :  { %v1092_v57 = vpop.f32.mrb[28].mxu0  ;;  %1269 = vmatprep.subr.bf16.mxu1 %v1268_v56 }
 0x328   :  { %v601_v58 = vpop.f32.mrb[29].mxu0  ;;  %1271 = vmatpush3.bf16.msra.mxu1 %v1268_v56 }
 0x329   :  { %v1272_v59 = vpack.c.bf16 %v1092_v57, %v601_v58 }
 0x32b   :  { %v1095_v60 = vpop.f32.mrb[30].mxu0  ;;  %1273 = vmatprep.subr.bf16.mxu1 %v1272_v59 }
 0x32c   :  { %v611_v61 = vpop.f32.mrb[31].mxu0  ;;  %1275 = vmatpush3.bf16.msra.mxu1 %v1272_v59 }
 0x32d   :  { %v1276_v62 = vpack.c.bf16 %v1095_v60, %v611_v61 }
 0x32f   :  { %1277 = vmatprep.subr.bf16.mxu1 %v1276_v62 }
 0x330   :  { %1279 = vmatpush3.bf16.msra.mxu1 %v1276_v62 }
 0x333   :  { %1129 = vmatmul.mubr.f32.vlgmr.msra.gmra.mrb[16].mxu1 %v1514_v22 }
 0x334   :  { %1131 = vmatprep.mubr.f32.mxu1 %v1516_v23 }
 0x337   :  { %1132 = vmatmul.mubr.f32.gmra.mrb[18].mxu1 %v1520_v24 }
 0x338   :  { %1134 = vmatprep.mubr.f32.mxu1 %v1522_v25 }
 0x33b   :  { %1135 = vmatmul.mubr.f32.gmra.mrb[20].mxu1 %v1526_v26 }
 0x33c   :  { %1137 = vmatprep.mubr.f32.mxu1 %v1528_v27 }
 0x33f   :  { %1138 = vmatmul.mubr.f32.gmra.mrb[22].mxu1 %v1532_v28 }
 0x340   :  { %1140 = vmatprep.mubr.f32.mxu1 %v1534_v29 }
 0x343   :  { %1141 = vmatmul.mubr.f32.gmra.mrb[24].mxu1 %v1538_v30 }
 0x344   :  { %1143 = vmatprep.mubr.f32.mxu1 %v1540_v31 }
 0x347   :  { %1144 = vmatmul.mubr.f32.gmra.mrb[26].mxu1 %v1544_v32 }
 0x348   :  { %1146 = vmatprep.mubr.f32.mxu1 %v1546_v33 }
 0x34b   :  { %1147 = vmatmul.mubr.f32.gmra.mrb[28].mxu1 %v1550_v34 }
 0x34c   :  { %1149 = vmatprep.mubr.f32.mxu1 %v1552_v35 }
 0x34f   :  { %1150 = vmatmul.mubr.f32.gmra.mrb[30].mxu1 %v1556_v36 }
 0x406   :  { %v1130_v22 = vpop.f32.mrb[16].mxu1 }
 0x407   :  { %766 = vst [vmem:[#allocation10 + $0x8] sm:$0xff] %v1130_v22  ;;  %v686_v23 = vpop.f32.mrb[17].mxu1 }
 0x408   :  { %765 = vst [vmem:[#allocation10] sm:$0xff] %v686_v23 }
 0x40a   :  { %v1133_v24 = vpop.f32.mrb[18].mxu1 }
 0x40b   :  { %768 = vst [vmem:[#allocation10 + $0x18] sm:$0xff] %v1133_v24  ;;  %v696_v25 = vpop.f32.mrb[19].mxu1 }
 0x40c   :  { %767 = vst [vmem:[#allocation10 + $0x10] sm:$0xff] %v696_v25 }
 0x40e   :  { %v1136_v26 = vpop.f32.mrb[20].mxu1 }
 0x40f   :  { %770 = vst [vmem:[#allocation10 + $0x28] sm:$0xff] %v1136_v26  ;;  %v706_v27 = vpop.f32.mrb[21].mxu1 }
 0x410   :  { %769 = vst [vmem:[#allocation10 + $0x20] sm:$0xff] %v706_v27 }
 0x412   :  { %v1139_v28 = vpop.f32.mrb[22].mxu1 }
 0x413   :  { %772 = vst [vmem:[#allocation10 + $0x38] sm:$0xff] %v1139_v28  ;;  %v716_v29 = vpop.f32.mrb[23].mxu1 }
 0x414   :  { %771 = vst [vmem:[#allocation10 + $0x30] sm:$0xff] %v716_v29 }
 0x416   :  { %v1142_v30 = vpop.f32.mrb[24].mxu1 }
 0x417   :  { %774 = vst [vmem:[#allocation10 + $0x48] sm:$0xff] %v1142_v30  ;;  %v726_v31 = vpop.f32.mrb[25].mxu1 }
 0x418   :  { %773 = vst [vmem:[#allocation10 + $0x40] sm:$0xff] %v726_v31 }
 0x41a   :  { %v1145_v32 = vpop.f32.mrb[26].mxu1 }
 0x41b   :  { %776 = vst [vmem:[#allocation10 + $0x58] sm:$0xff] %v1145_v32  ;;  %v736_v33 = vpop.f32.mrb[27].mxu1 }
 0x41c   :  { %775 = vst [vmem:[#allocation10 + $0x50] sm:$0xff] %v736_v33 }
 0x41e   :  { %v1148_v34 = vpop.f32.mrb[28].mxu1 }
 0x41f   :  { %778 = vst [vmem:[#allocation10 + $0x68] sm:$0xff] %v1148_v34  ;;  %v746_v35 = vpop.f32.mrb[29].mxu1 }
 0x420   :  { %777 = vst [vmem:[#allocation10 + $0x60] sm:$0xff] %v746_v35 }
 0x422   :  { %v1151_v36 = vpop.f32.mrb[30].mxu1 }
 0x423   :  { %780 = vst [vmem:[#allocation10 + $0x78] sm:$0xff] %v1151_v36  ;;  %v756_v63 = vpop.f32.mrb[31].mxu1 }
 0x424   :  { %779 = vst [vmem:[#allocation10 + $0x70] sm:$0xff] %v756_v63 }
 0x425   :  { %1386 = shalt.err (!%p1383_p8)
}
 0x426   :  { %s1387_s15 = scalar_lea.hbm %s1594_s4, 2048 }
 0x427   :  { %p1388_p9 = scmp.ne.s32.totalorder %s1594_s4, %s1387_s15  ;;  %p1391_p10 = scmp.lt.u32.totalorder %s1387_s15, %s1594_s4 }
 0x429   :  { %p1393_p11 = pnand %p1391_p10, %p1388_p9 }
 0x42b   :  { %1396 = shalt.err (!%p1393_p11)
}
 0x42c   :  { %792 = dma.vmem_to_hbm [thread:$0]  %s787_s12, 2048, %s1594_s4, [#allocation4], %s1407_s27, %s1407_s27, %s1408_s28  }
 0x42d   :  { %1403 = dma.done.wait [#allocation4], 2048  }
 0x42e   :  { %1404 = vsyncadd [#allocation4], 4294965248 }
 0x42f   :  { %796 = vsyncpa [#allocation3], 1 }
 0x430   :  { %797 = vsyncpa [#allocation6], 1 }
 0x431   :  { %798 = vsyncpa [#allocation9], 1 }
 0x432   :  { %799 = vsyncpa [#allocation4], 1 }

</bundles_post_ra>
